<compile_context>
chip_gen: v5e
topology: v5e:2x2
jax: 0.10.0
libtpu: 0.0.40
codegen_flags: <defaults>
</compile_context>

<pallas_src>
import jax
import jax.numpy as jnp
from jax.experimental import pallas as pl
from jax.experimental.pallas import tpu as pltpu


def _make_kernel(n_total: int, k_total: int, needs_mask: bool):
    k_total_f = float(k_total)

    def kernel(preds_ref, xt_ref, out_ref):
        x = preds_ref[...].astype(jnp.float32)              # (TN, K), cast in-kernel
        tn = x.shape[0]

        # numerically stable per-row log-sum-exp along the class (lane) axis
        m = jnp.max(x, axis=-1, keepdims=True)               # (TN, 1)
        lse = jnp.log(jnp.sum(jnp.exp(x - m), axis=-1, keepdims=True))   # (TN, 1)
        row_sum = jnp.sum(x, axis=-1, keepdims=True)          # (TN, 1)

        mpl = m + lse                                          # (TN, 1) = logsumexp(x)
        # sum_k(-logp_i) = K * logsumexp_i - sum_k x_ik
        smooth_rows = k_total_f * mpl - row_sum                # (TN, 1)
        # -logp[i, t_i] = logsumexp_i - x[i, t_i]   (x_t gathered in the wrapper)
        nll_rows = mpl - xt_ref[...]                           # (TN, 1)

        if needs_mask:
            # Mask only the per-row results (where-select: pad rows may be
            # non-finite, and reductions never cross rows so they can't
            # contaminate valid rows).
            i = pl.program_id(0)
            row = jax.lax.broadcasted_iota(jnp.int32, (tn, 1), 0) + i * tn
            valid = row < n_total
            smooth_rows = jnp.where(valid, smooth_rows, 0.0)
            nll_rows = jnp.where(valid, nll_rows, 0.0)

        s_smooth = jnp.sum(smooth_rows)                        # scalar partials
        s_nll = jnp.sum(nll_rows)

        # lane-dense (1, 128) partial tile: lane 0 = smooth sum, lane 1 = nll sum
        lane = jax.lax.broadcasted_iota(jnp.int32, (1, 1, 128), 2)
        out_ref[...] = jnp.where(lane == 0, s_smooth,
                                 jnp.where(lane == 1, s_nll, 0.0))

    return kernel


def _vmem_capacity_bytes() -> int:
    try:
        return int(pltpu.get_tpu_info().vmem_capacity_bytes)
    except Exception:
        return 64 * 1024 * 1024          # conservative default (v7x-sized)


def label_smoothing_ce(preds: jax.Array, target: jax.Array,
                       epsilon: float = 0.1, block_n: int | None = None) -> jax.Array:
    """preds: (N, K) float (any float dtype); target: (N,) int. Scalar f32 loss."""
    n, k = preds.shape
    itemsize = jnp.dtype(preds.dtype).itemsize

    # sublane-packing-aware row alignment: 8 for f32, 16 for bf16, 32 for 8-bit
    if itemsize == 1:
        align = 32
    elif itemsize == 2:
        align = 16
    else:
        align = 8

    # generation-aware VMEM budget
    vmem_cap = _vmem_capacity_bytes()
    small_vmem = vmem_cap < 100 * 1024 * 1024        # v7x-class part (64 MiB / TC)
    if small_vmem:
        budget_bytes = 28 * 1024 * 1024
        vmem_limit = 48 * 1024 * 1024
    else:                                            # v5e / v6e (128 MiB)
        budget_bytes = 80 * 1024 * 1024
        vmem_limit = 100 * 1024 * 1024

    if block_n is None:
        # Per-step cost: 2x double-buffered native-dtype input rows plus ~3 f32
        # full-row temporaries (x cast, exp temp, headroom).  Cap raised to 8192
        # rows so small-K shapes get a multi-MiB per-step DMA.
        per_row_bytes = 2 * k * itemsize + 3 * k * 4
        block_n = budget_bytes // per_row_bytes
        block_n = max(align, min(8192, (block_n // align) * align))

    n_pad = ((n + align - 1) // align) * align
    block_n = int(max(align, min(block_n, n_pad)))

    # On 2-TC parts (v7x), avoid a single-step grid when the batch spans more
    # than one minimal block, so both TensorCores get work.
    if small_vmem and block_n >= n_pad and n_pad > align:
        half = (n + 1) // 2
        block_n = int(max(align, ((half + align - 1) // align) * align))

    grid = pl.cdiv(n, block_n)
    needs_mask = (n % block_n) != 0

    # Hoist the target-logit gather to the wrapper (N elements, negligible).
    xt = jnp.take_along_axis(
        preds, target.astype(jnp.int32).reshape(n, 1), axis=-1
    ).astype(jnp.float32)                                       # (N, 1)

    partials = pl.pallas_call(
        _make_kernel(n, k, needs_mask),
        out_shape=jax.ShapeDtypeStruct((grid, 1, 128), jnp.float32),
        grid_spec=pltpu.PrefetchScalarGridSpec(
            num_scalar_prefetch=0,
            grid=(grid,),
            in_specs=[
                pl.BlockSpec((block_n, k), lambda i: (i, 0)),   # preds tile (native dtype)
                pl.BlockSpec((block_n, 1), lambda i: (i, 0)),   # gathered target logits
            ],
            out_specs=pl.BlockSpec((1, 1, 128), lambda i: (i, 0, 0)),
        ),
        compiler_params=pltpu.CompilerParams(
            dimension_semantics=("parallel",),      # independent blocks -> megacore on v7x
            vmem_limit_bytes=int(vmem_limit),
        ),
    )(preds, xt)

    # tiny final combine in plain JAX (true class count K, true batch N)
    smooth_sum = jnp.sum(partials[:, 0, 0])
    nll_sum = jnp.sum(partials[:, 0, 1])
    loss_mean = smooth_sum / n
    nll_mean = nll_sum / n
    return epsilon * (loss_mean / k) + (1.0 - epsilon) * nll_mean


def _reference(preds, target, epsilon=0.1):
    logp = jax.nn.log_softmax(preds.astype(jnp.float32), axis=-1)
    n, k = preds.shape
    loss = jnp.mean(-jnp.sum(logp, axis=-1))
    nll = jnp.mean(-logp[jnp.arange(n), target])
    return epsilon * loss / k + (1.0 - epsilon) * nll


if __name__ == "__main__":
    key = jax.random.PRNGKey(0)
    kp, kt = jax.random.split(key)
    N, K = 16, 32                      # small shapes: batch=16, num_classes=32
    preds = jax.random.normal(kp, (N, K), dtype=jnp.float32)
    target = jax.random.randint(kt, (N,), 0, K, dtype=jnp.int32)

    out = label_smoothing_ce(preds, target, epsilon=0.1)
    out = jax.block_until_ready(out)

    ref = _reference(preds, target, epsilon=0.1)
    assert jnp.allclose(out, ref, rtol=1e-5, atol=1e-5), (out, ref)
    print("KERNEL_OK")
</pallas_src>

<mosaic_0001>
module attributes {stable_mosaic.version = 11 : i64} {
  func.func @kernel(%arg0: i32, %arg1: memref<8x32xf32, #tpu.memory_space<vmem>>, %arg2: memref<8x1xf32, #tpu.memory_space<vmem>>, %arg3: memref<1x1x128xf32, #tpu.memory_space<vmem>>) attributes {dimension_semantics = [#tpu.dimension_semantics<parallel>], iteration_bounds = array<i64: 2>, scalar_prefetch = 0 : i64, scratch_operands = 0 : i64, tpu.core_type = #tpu.core_type<tc>, window_params = [{transform_indices = @transform_0, window_bounds = array<i64: 8, 32>}, {transform_indices = @transform_1, window_bounds = array<i64: 8, 1>}, {transform_indices = @transform_2, window_bounds = array<i64: 1, 1, 128>}]} {
    %c0 = arith.constant 0 : index
    %c0_0 = arith.constant 0 : index
    %0 = vector.load %arg1[%c0, %c0_0] : memref<8x32xf32, #tpu.memory_space<vmem>>, vector<8x32xf32>
    %cst = arith.constant dense<0xFF800000> : vector<8xf32>
    %1 = vector.multi_reduction <maximumf>, %0, %cst [1] : vector<8x32xf32> to vector<8xf32>
    %2 = vector.shape_cast %1 : vector<8xf32> to vector<8x1xf32>
    %3 = vector.broadcast %2 : vector<8x1xf32> to vector<8x32xf32>
    %4 = arith.subf %0, %3 : vector<8x32xf32>
    %5 = math.exp %4 : vector<8x32xf32>
    %cst_1 = arith.constant dense<0.000000e+00> : vector<8xf32>
    %6 = vector.multi_reduction <add>, %5, %cst_1 [1] : vector<8x32xf32> to vector<8xf32>
    %7 = vector.shape_cast %6 : vector<8xf32> to vector<8x1xf32>
    %8 = math.log %7 : vector<8x1xf32>
    %cst_2 = arith.constant dense<0.000000e+00> : vector<8xf32>
    %9 = vector.multi_reduction <add>, %0, %cst_2 [1] : vector<8x32xf32> to vector<8xf32>
    %10 = vector.shape_cast %9 : vector<8xf32> to vector<8x1xf32>
    %11 = arith.addf %2, %8 : vector<8x1xf32>
    %cst_3 = arith.constant 3.200000e+01 : f32
    %12 = vector.broadcast %cst_3 : f32 to vector<8x1xf32>
    %13 = arith.mulf %12, %11 : vector<8x1xf32>
    %14 = arith.subf %13, %10 : vector<8x1xf32>
    %c0_4 = arith.constant 0 : index
    %c0_5 = arith.constant 0 : index
    %15 = vector.load %arg2[%c0_4, %c0_5] : memref<8x1xf32, #tpu.memory_space<vmem>>, vector<8x1xf32>
    %16 = arith.subf %11, %15 : vector<8x1xf32>
    %17 = vector.shape_cast %14 : vector<8x1xf32> to vector<1x8x1xf32>
    %cst_6 = arith.constant dense<0.000000e+00> : vector<1xf32>
    %18 = vector.multi_reduction <add>, %17, %cst_6 [1, 2] : vector<1x8x1xf32> to vector<1xf32>
    %19 = vector.shape_cast %18 : vector<1xf32> to vector<1x1x1xf32>
    %20 = vector.extract %19[0, 0, 0] : f32 from vector<1x1x1xf32>
    %21 = vector.shape_cast %16 : vector<8x1xf32> to vector<1x8x1xf32>
    %cst_7 = arith.constant dense<0.000000e+00> : vector<1xf32>
    %22 = vector.multi_reduction <add>, %21, %cst_7 [1, 2] : vector<1x8x1xf32> to vector<1xf32>
    %23 = vector.shape_cast %22 : vector<1xf32> to vector<1x1x1xf32>
    %24 = vector.extract %23[0, 0, 0] : f32 from vector<1x1x1xf32>
    %25 = tpu.iota {dimensions = array<i32: 2>} : vector<1x1x128xi32>
    %c0_i32 = arith.constant 0 : i32
    %26 = vector.broadcast %c0_i32 : i32 to vector<1x1x128xi32>
    %27 = arith.cmpi eq, %25, %26 : vector<1x1x128xi32>
    %c1_i32 = arith.constant 1 : i32
    %28 = vector.broadcast %c1_i32 : i32 to vector<1x1x128xi32>
    %29 = arith.cmpi eq, %25, %28 : vector<1x1x128xi32>
    %cst_8 = arith.constant 0.000000e+00 : f32
    %30 = vector.broadcast %24 : f32 to vector<1x1x128xf32>
    %31 = vector.broadcast %cst_8 : f32 to vector<1x1x128xf32>
    %32 = arith.select %29, %30, %31 : vector<1x1x128xi1>, vector<1x1x128xf32>
    %33 = vector.broadcast %20 : f32 to vector<1x1x128xf32>
    %34 = arith.select %27, %33, %32 : vector<1x1x128xi1>, vector<1x1x128xf32>
    %c0_9 = arith.constant 0 : index
    %c0_10 = arith.constant 0 : index
    %c0_11 = arith.constant 0 : index
    %35 = vector.load %arg3[%c0_9, %c0_10, %c0_11] : memref<1x1x128xf32, #tpu.memory_space<vmem>>, vector<1x1x128xf32>
    tpu.vector_store %arg3[%c0_9, %c0_10, %c0_11], %34 {strides = array<i32>} : memref<1x1x128xf32, #tpu.memory_space<vmem>>, vector<1x1x128xf32>,
    return
  }
  func.func @transform_0(%arg0: i32) -> (i32, i32) {
    %c0_i32 = arith.constant 0 : i32
    %c0_i32_0 = arith.constant 0 : i32
    return %arg0, %c0_i32 : i32, i32
  }
  func.func @transform_1(%arg0: i32) -> (i32, i32) {
    %c0_i32 = arith.constant 0 : i32
    %c0_i32_0 = arith.constant 0 : i32
    return %arg0, %c0_i32 : i32, i32
  }
  func.func @transform_2(%arg0: i32) -> (i32, i32, i32) {
    %c0_i32 = arith.constant 0 : i32
    %c0_i32_0 = arith.constant 0 : i32
    %c0_i32_1 = arith.constant 0 : i32
    return %arg0, %c0_i32, %c0_i32_0 : i32, i32, i32
  }
}

</mosaic_0001>

<bundles_post_ra>
// kernel: tpu_custom_call.1
= control target key start
LH: loop header
LB: loop body
LE: loop exit
PB: predicated region body
PF: predicated region fallthrough
CT: control target
= control target key end

     0   :  { %7 = vsyncpa [#allocation3], 0  ;;  %s508_s0 = inlined_call_operand.vmem [shape: f32[16,32], index: 0, kind: input, shape index: {}]   ;;  %s509_s1 = inlined_call_operand.vmem [shape: f32[16,1], index: 1, kind: input, shape index: {}]   ;;  %s510_s2 = inlined_call_operand.hbm [shape: f32[2,1,128], index: 2, kind: output, shape index: {}]  }
   0x1   :  { %9 = vsyncpa [#allocation3 + $0x1], 0  ;;  %s420_s9 = smov 0   ;;  %s422_s10 = smov 0  }
   0x2   :  { %s424_s11 = smov 0   ;;  %s426_s12 = smov 0  }
   0x3 LB: > { %s441_s13 = sadd.s32 4294967295, %s403_s12   ;;  %s286_s14 = sadd.s32 4294967294, %s403_s12   ;;  %s403_s12 = sphi %s426_s12, %s516_s12   ;;  %s399_s11 = sphi %s424_s11, %s515_s11   ;;  %s395_s10 = sphi %s422_s10, %s514_s10   ;;  %s391_s9 = sphi %s420_s9, %s513_s9  }
   0x4   : > { %s445_s15 = sadd.s32 1, %s403_s12   ;;  %s74_s16 = sadd.s32 1, %s399_s11 }
   0x5   : > { %s71_s17 = ssub.s32 %s403_s12, %s445_s15  ;;  %p84_p0 = scmp.ne.s32.totalorder %s399_s11, %s395_s10 }
   0x6   : > { %p72_p1 = scmp.eq.s32.totalorder %s71_s17, 0  ;;  %p85_p2 = scmp.eq.s32.totalorder %s441_s13, 1 }
   0x7   : > { %p90_p3 = scmp.ne.s32.totalorder %s395_s10, %s391_s9  ;;  %p91_p4 = scmp.eq.s32.totalorder %s286_s14, 1 }
   0x8   : > { %s456_s18 = scalar_select %p72_p1, %s399_s11, %s74_s16  }
   0x9   : > { %p458_p5 = por %p85_p2, %p84_p0  ;;  %p462_p6 = por %p91_p4, %p90_p3 }
   0xa   : > { %p289_p7 = scmp.ge.s32.totalorder %s403_s12, 1  ;;  %p123_p8 = scmp.lt.s32.totalorder %s403_s12, 3 }
   0xc   : > { %p124_p9 = pnand %p289_p7, %p123_p8 }
   0xd   : > { %p147_p10 = scmp.lt.s32.totalorder (!%p124_p9), %s441_s13, 1  ;;  %s145_s29 = sand.u32 (!%p124_p9), 1, %s395_s10  }
   0xe   : > { %127 = sbr.rel (%p124_p9) target bundleno = 470 (0x1d6), region = 28  ;;  %s215_s4 = scalar_lea.hbm (!%p124_p9), %s510_s2, %s441_s13 }
   0xf   : > { %s146_s5 = scalar_lea.vmem (!%p124_p9), [#allocation2], %s145_s29  ;;  %s219_s8 = sshll.u32 (!%p124_p9), %s215_s4, 4  ;;  %s220_s8 = int_to_ptr.hbm [resolvable:$true] %s219_s8 }
  0x10   : > { %s217_s6 = sshll.u32 (!%p124_p9), %s146_s5, 4  ;;  %s207_s16 = scalar_lea.sflag (!%p124_p9), [#allocation3], %s145_s29  ;;  %s218_s6 = int_to_ptr.vmem [resolvable:$true] %s217_s6 }
  0x11   : > { %s355_s17 = sshra.s32 (!%p124_p9), %s220_s8, 4  ;;  %s361_s23 = scalar_lea.hbm (!%p124_p9), %s510_s2, 2  ;;  %s356_s17 = int_to_ptr.hbm [resolvable:$true] %s355_s17 }
  0x12   : > { %p362_p0 = scmp.lt.s32.totalorder (!%p124_p9), %s356_s17, %s510_s2 }
  0x13   : > { %s148_s21 = scalar_select %p147_p10, %s441_s13, 1  ;;  %vm156_vm0 = vcmask 261120   ;;  %vm176_vm1 = vcmask 7168   ;;  %v197_v33 = vlaneseq }
  0x15   : > { %s290_s22 = sshll.u32 %s148_s21, 3  ;;  %v198_v34 = vand.u32 127, %v197_v33  ;;  %s357_s21 = scalar_lea.hbm %s356_s17, 1 }
  0x16   : > { %s150_s25 = scalar_lea.vmem %s508_s0, %s290_s22  ;;  %s154_s28 = scalar_lea.vmem %s509_s1, %s290_s22 }
  0x17   : > { %v155_v0 = vld [vmem:[%s150_s25] sm:$0xff]  ;;  %vm200_vm2 = vcmp.eq.s32.totalorder %v198_v34, 1  ;;  %vm199_vm3 = vcmp.eq.s32.totalorder %v198_v34, 0  ;;  %p358_p11 = scmp.ne.s32.totalorder %s356_s17, %s357_s21  ;;  %p363_p1 = scmp.lt.s32.totalorder %s361_s23, %s357_s21 }
  0x18   : > { %v157_v1 = vsel %vm156_vm0, %v155_v0, -inf  ;;  %v168_v2 = vsel %vm156_vm0, %v155_v0, 0.0  ;;  %v174_v11 = vld [vmem:[%s154_s28] sm:$0xff] }
  0x19   : > { %158 = vmax.xlane.f32.xlu0 %v157_v1  ;;  %169 = vadd.xlane.f32.xlu1 %v168_v2  ;;  %p359_p12 = pnand %p358_p11, %p458_p5  ;;  %p364_p2 = por %p363_p1, %p362_p0 }
  0x1b   : > { %p360_p13 = pneg %p359_p12 }
  0x1d   : > { %p365_p3 = pnand %p364_p2, %p360_p13 }
  0x8c   : > { %v159_v3 = vpop.xlane.xlu0 %158  ;;  %v170_v13 = vpop.xlane.xlu1 %169 }
  0x8d   : > { %v160_v4 = vsub.f32 %v155_v0, %v159_v3 }
  0x8f   : > { %v161_v5 = vmul.f32 1.442695, %v160_v4 }
  0x91   : > { %337 = vpow2.f32 %v161_v5 }
  0x97   : > { %v338_v6 = vpop.eup %337 }
  0x98   : > { %v163_v7 = vsel %vm156_vm0, %v338_v6, 0.0 }
  0x99   : > { %164 = vadd.xlane.f32.xlu0 %v163_v7 }
 0x10c   : > { %v165_v8 = vpop.xlane.xlu0 %164 }
 0x10d   : > { %339 = vlog2.f32 %v165_v8 }
 0x113   : > { %v340_v9 = vpop.eup %339 }
 0x114   : > { %v167_v10 = vmul.f32 0.6931472, %v340_v9 }
 0x116   : > { %v171_v12 = vadd.f32 %v167_v10, %v159_v3 }
 0x118   : > { %v172_v14 = vmul.f32 32.0, %v171_v12  ;;  %v175_v15 = vsub.f32 %v171_v12, %v174_v11 }
 0x11a   : > { %v173_v16 = vsub.f32 %v172_v14, %v170_v13  ;;  %v187_v17 = vsel %vm176_vm1, %v175_v15, 0.0 }
 0x11b   : > { %188 = vadd.xlane.f32.xlu2 %v187_v17 }
 0x11c   : > { %v177_v18 = vsel %vm176_vm1, %v173_v16, 0.0 }
 0x11d   : > { %178 = vadd.xlane.f32.xlu1 %v177_v18 }
 0x18e   : > { %v189_v19 = vpop.xlane.xlu2 %188 }
 0x18f   : > { %v190_v20 = vrot.slane %v189_v19, 4 }
 0x190   : > { %v179_v21 = vpop.xlane.xlu1 %178 }
 0x191   : > { %v191_v22 = vadd.f32 %v190_v20, %v189_v19  ;;  %v180_v23 = vrot.slane %v179_v21, 4 }
 0x193   : > { %v192_v24 = vrot.slane %v191_v22, 2  ;;  %v181_v25 = vadd.f32 %v180_v23, %v179_v21 }
 0x195   : > { %v193_v26 = vadd.f32 %v192_v24, %v191_v22  ;;  %v182_v27 = vrot.slane %v181_v25, 2 }
 0x197   : > { %v183_v28 = vadd.f32 %v182_v27, %v181_v25  ;;  %v194_v29 = vrot.slane %v193_v26, 1 }
 0x199   : > { %v184_v30 = vrot.slane %v183_v28, 1  ;;  %v195_v32 = vadd.f32 %v194_v29, %v193_v26 }
 0x19b   : > { %v185_v31 = vadd.f32 %v184_v30, %v183_v28 }
 0x19d   : > { %294 = vpush %v185_v31 }
 0x19e   : > { %296 = vpush %v195_v32 }
 0x1ce   : > { %s295_s7 = spop %294 }
 0x1cf   : > { %v203_v35 = vstv %s295_s7  ;;  %s297_s14 = spop %296 }
 0x1d0   : > { %v201_v36 = vstv %s297_s14 }
 0x1d1   : > { %v202_v37 = vsel %vm200_vm2, %v201_v36, 0.0 }
 0x1d2   : > { %v204_v38 = vsel %vm199_vm3, %v203_v35, %v202_v37 }
 0x1d3   : > { %205 = vst [vmem:[%s146_s5] sm:$0x1] %v204_v38 }
 0x1d4   : > { %368 = shalt.err (!%p365_p3)
}
 0x1d5   : > { %298 = dma.vmem_to_hbm [thread:$0]  (%p458_p5), %s218_s6, 16, %s220_s8, %s207_s16  }
 0x1d6 PF: > { %p304_p4 = scmp.ge.s32.totalorder %s403_s12, 2  ;;  %s231_s26 = sand.u32 1, %s391_s9  }
 0x1d7   : > { %s232_s27 = scalar_lea.sflag [#allocation3], %s231_s26 }
 0x1d8   : > { %p301_p7 = pnand %p304_p4, %p462_p6 }
 0x1da   : > { %p302_p8 = pneg %p301_p7 }
 0x1dc   : > { %386 = dma.done.wait (%p302_p8), %s232_s27, 16  }
 0x1dd   : > { %388 = vsyncadd (%p302_p8), %s232_s27, 4294967280  ;;  %p12_p9 = scmp.ge.s32.totalorder %s445_s15, 4   ;;  %s513_s9 = smov %s395_s10 }
 0x1de   : > { %s514_s10 = smov %s399_s11  ;;  %s515_s11 = smov %s456_s18 }
 0x1df   : > { %s516_s12 = smov %s445_s15  ;;  %14 = sbr.rel (!%p12_p9) target bundleno = 3 (0x3), region = 66 }
 0x1e4   :  { %237 = vsyncpa [#allocation3], 1 }
 0x1e5   :  { %239 = vsyncpa [#allocation3 + $0x1], 1 }

</bundles_post_ra>
